<compile_context>
chip_gen: v7x
topology: tpu7x:2x2x1
jax: 0.10.0
libtpu: 0.0.40
codegen_flags: <defaults>
</compile_context>

<pallas_src>
import jax
import jax.numpy as jnp
from jax.experimental import pallas as pl
from jax.experimental.pallas import tpu as pltpu

LEAKY_SLOPE = 0.01  # nn.LeakyReLU() default


def _leaky_relu(v):
    return jnp.where(v > 0, v, LEAKY_SLOPE * v)


def _round_up(v, m):
    return ((v + m - 1) // m) * m


def contrast_encoder_kernel(x_ref, adj_ref, wg_ref, bg_ref,
                            w1_ref, b1_ref, w2_ref, b2_ref,
                            out_ref, h_scratch):
    """Single invocation over the whole (padded) batch.

    x_ref   : (B*N, Dp) bf16   node features, batch flattened into rows
    adj_ref : (B, N, N) f32    per-graph adjacency (exact 0/1 values)
    wg_ref  : (Dp, Dp)  bf16   graph-encoder weight     bg_ref: (1, Dp) f32
    w1_ref  : (Dp, Dp)  bf16   MLP layer-1 weight       b1_ref: (1, Dp) f32
    w2_ref  : (Dp, Hp)  bf16   MLP layer-2 weight       b2_ref: (1, Hp) f32
    out_ref : (B*N, Hp) f32
    h_scratch: (B*N, Dp) f32 VMEM scratch for the graph-mixed activations
    """
    B, N, _ = adj_ref.shape

    # ---- graph encoder ------------------------------------------------------
    # One slab matmul for all batch elements: (B*N, Dp) @ (Dp, Dp), f32 acc.
    xw = jnp.dot(x_ref[...], wg_ref[...], preferred_element_type=jnp.float32)

    # Per-graph adjacency mix adj[b] @ xw[b].  B is a small static constant, so
    # this Python loop fully unrolls at trace time (switch to lax.fori_loop with
    # unroll=True if B grows).  Slices are sublane-aligned (N = 8).
    for b in range(B):
        adj_b = adj_ref[b]                                # (N, N) f32, exact 0/1
        xw_b = xw[b * N:(b + 1) * N, :]                   # static slice of the slab
        h_scratch[pl.ds(b * N, N), :] = jnp.dot(
            adj_b, xw_b, preferred_element_type=jnp.float32)

    h = _leaky_relu(h_scratch[...] + bg_ref[...])         # f32 elementwise (v5e-safe)

    # ---- common_proj_mlp: Linear -> LeakyReLU -> (dropout: eval no-op) -> Linear
    y = jnp.dot(h.astype(w1_ref.dtype), w1_ref[...],
                preferred_element_type=jnp.float32) + b1_ref[...]
    y = _leaky_relu(y)
    # TODO(synk): dropout_p=0.3 is the identity in eval mode; train-mode dropout
    # (pltpu.prng_random_bits mask) is not implemented.
    out = jnp.dot(y.astype(w2_ref.dtype), w2_ref[...],
                  preferred_element_type=jnp.float32) + b2_ref[...]

    out_ref[...] = out.astype(out_ref.dtype)              # lane-dense full store


def contrast_encoder(p_gfeature, p_adj, params, docnum=None, secnum=None,
                     compute_dtype=jnp.bfloat16):
    """p_gfeature: (B, N, D_in), p_adj: (B, N, N).  docnum/secnum kept for API
    parity with the PyTorch module; unused by this synthetic graph encoder."""
    B, N, D_in = p_gfeature.shape
    H = params["w2"].shape[1]
    Dp = max(_round_up(D_in, 128), 128)   # lane-dense feature dim
    Hp = max(_round_up(H, 128), 128)      # lane-dense output dim
    cdt = compute_dtype

    # ---- wrapper-side zero padding + dtype staging (zero padding is exact) ---
    x2d = jnp.pad(p_gfeature.astype(jnp.float32),
                  ((0, 0), (0, 0), (0, Dp - D_in))).reshape(B * N, Dp).astype(cdt)
    # adj holds exact 0/1 and is tiny (B*N*N); kept f32 so the graph mix runs on
    # the full-precision accumulator.  At production N, ship it bf16 to halve DMA.
    adj = p_adj.astype(jnp.float32)

    def pad2(w, r, c):
        w = w.astype(jnp.float32)
        return jnp.pad(w, ((0, r - w.shape[0]), (0, c - w.shape[1])))

    wg = pad2(params["wg"], Dp, Dp).astype(cdt)
    w1 = pad2(params["w1"], Dp, Dp).astype(cdt)
    w2 = pad2(params["w2"], Dp, Hp).astype(cdt)
    bg = pad2(params["bg"], 1, Dp)            # biases stay f32 (padded cols = 0)
    b1 = pad2(params["b1"], 1, Dp)
    b2 = pad2(params["b2"], 1, Hp)

    operands = (x2d, adj, wg, bg, w1, b1, w2, b2)

    flops = 2 * (B * N) * Dp * Dp          # x @ Wg
    flops += 2 * B * N * N * Dp            # adj @ (xW)
    flops += 2 * (B * N) * Dp * Dp         # h @ W1
    flops += 2 * (B * N) * Dp * Hp         # y @ W2
    bytes_accessed = sum(int(a.size) * a.dtype.itemsize for a in operands)
    bytes_accessed += (B * N) * Hp * 4     # f32 output

    vmem_spec = pl.BlockSpec(memory_space=pltpu.MemorySpace.VMEM)

    out2d = pl.pallas_call(
        contrast_encoder_kernel,
        out_shape=jax.ShapeDtypeStruct((B * N, Hp), jnp.float32),
        in_specs=[vmem_spec] * len(operands),
        out_specs=vmem_spec,
        scratch_shapes=[pltpu.VMEM((B * N, Dp), jnp.float32)],
        cost_estimate=pl.CostEstimate(flops=flops, transcendentals=0,
                                      bytes_accessed=bytes_accessed),
    )(*operands)

    return out2d.reshape(B, N, Hp)[:, :, :H]


def init_params(key, in_dim, hidden_dim):
    k = jax.random.split(key, 6)
    s_in = 1.0 / jnp.sqrt(in_dim)
    return {
        "wg": jax.random.uniform(k[0], (in_dim, in_dim), jnp.float32, -s_in, s_in),
        "bg": jax.random.uniform(k[1], (1, in_dim), jnp.float32, -s_in, s_in),
        "w1": jax.random.uniform(k[2], (in_dim, in_dim), jnp.float32, -s_in, s_in),
        "b1": jax.random.uniform(k[3], (1, in_dim), jnp.float32, -s_in, s_in),
        "w2": jax.random.uniform(k[4], (in_dim, hidden_dim), jnp.float32, -s_in, s_in),
        "b2": jax.random.uniform(k[5], (1, hidden_dim), jnp.float32, -s_in, s_in),
    }


def reference_bf16_policy(p_gfeature, p_adj, params, compute_dtype=jnp.bfloat16):
    """Pure-JAX reference mirroring the kernel's dtype policy exactly
    (bf16 storage / MXU inputs, f32 accumulation & elementwise)."""
    cdt = compute_dtype
    x = p_gfeature.astype(jnp.float32).astype(cdt)
    adj = p_adj.astype(jnp.float32)
    wg = params["wg"].astype(jnp.float32).astype(cdt)
    w1 = params["w1"].astype(jnp.float32).astype(cdt)
    w2 = params["w2"].astype(jnp.float32).astype(cdt)

    xw = jnp.einsum("bnd,de->bne", x, wg, preferred_element_type=jnp.float32)
    h = jnp.einsum("bnm,bme->bne", adj, xw, preferred_element_type=jnp.float32)
    h = _leaky_relu(h + params["bg"])
    y = jnp.einsum("bnd,de->bne", h.astype(cdt), w1,
                   preferred_element_type=jnp.float32) + params["b1"]
    y = _leaky_relu(y)
    return jnp.einsum("bnd,de->bne", y.astype(cdt), w2,
                      preferred_element_type=jnp.float32) + params["b2"]


def reference_f32(p_gfeature, p_adj, params):
    """Pure-f32 reference matching the PyTorch module semantics."""
    x = p_gfeature.astype(jnp.float32)
    adj = p_adj.astype(jnp.float32)
    h = jnp.einsum("bnm,bmd->bnd", adj, x @ params["wg"]) + params["bg"]
    h = _leaky_relu(h)
    y = h @ params["w1"] + params["b1"]
    y = _leaky_relu(y)
    return y @ params["w2"] + params["b2"]


if __name__ == "__main__":
    key = jax.random.PRNGKey(0)
    k_feat, k_adj, k_par = jax.random.split(key, 3)

    B, N, IN_DIM, HIDDEN = 2, 8, 32, 16        # small synthetic shapes
    p_gfeature = jax.random.normal(k_feat, (B, N, IN_DIM), jnp.float32)
    adj_logits = jax.random.uniform(k_adj, (B, N, N), jnp.float32)
    p_adj = (adj_logits > 0.5).astype(jnp.float32)
    docnum, secnum = 2, 4                      # unused by the synthetic graph encoder

    params = init_params(k_par, IN_DIM, HIDDEN)

    out = contrast_encoder(p_gfeature, p_adj, params, docnum, secnum)
    out = jax.block_until_ready(out)
    assert out.shape == (B, N, HIDDEN)

    # Correctness vs. a reference using the identical dtype policy (tight check).
    ref = reference_bf16_policy(p_gfeature, p_adj, params)
    assert jnp.allclose(out, ref, atol=1e-2, rtol=1e-2), \
        float(jnp.max(jnp.abs(out - ref)))

    # Informational: distance to the exact-f32 module semantics (bf16 rounding only).
    ref32 = reference_f32(p_gfeature, p_adj, params)
    _max_diff_vs_f32 = float(jnp.max(jnp.abs(out - ref32)))

    print("KERNEL_OK")
</pallas_src>

<mosaic_0001>
module attributes {stable_mosaic.version = 11 : i64} {
  func.func @contrast_encoder_kernel(%arg0: memref<16x128xbf16, #tpu.memory_space<vmem>>, %arg1: memref<2x8x8xf32, #tpu.memory_space<vmem>>, %arg2: memref<128x128xbf16, #tpu.memory_space<vmem>>, %arg3: memref<1x128xf32, #tpu.memory_space<vmem>>, %arg4: memref<128x128xbf16, #tpu.memory_space<vmem>>, %arg5: memref<1x128xf32, #tpu.memory_space<vmem>>, %arg6: memref<128x128xbf16, #tpu.memory_space<vmem>>, %arg7: memref<1x128xf32, #tpu.memory_space<vmem>>, %arg8: memref<16x128xf32, #tpu.memory_space<vmem>>, %arg9: memref<16x128xf32, #tpu.memory_space<vmem>>) attributes {dimension_semantics = [], scalar_prefetch = 0 : i64, scratch_operands = 1 : i64, tpu.core_type = #tpu.core_type<tc>} {
    %c0 = arith.constant 0 : index
    %c0_0 = arith.constant 0 : index
    %0 = vector.load %arg0[%c0, %c0_0] : memref<16x128xbf16, #tpu.memory_space<vmem>>, vector<16x128xbf16>
    %c0_1 = arith.constant 0 : index
    %c0_2 = arith.constant 0 : index
    %1 = vector.load %arg2[%c0_1, %c0_2] : memref<128x128xbf16, #tpu.memory_space<vmem>>, vector<128x128xbf16>
    %cst = arith.constant dense<0.000000e+00> : vector<16x128xf32>
    %2 = tpu.matmul %0, %1, %cst {dimension_numbers = #tpu.dot_dimension_numbers<[1], [0], [0], [1], [0, 0, 1, 1], [], []>} : vector<16x128xbf16>, vector<128x128xbf16>, vector<16x128xf32> -> vector<16x128xf32>
    %c0_3 = arith.constant 0 : index
    %c0_4 = arith.constant 0 : index
    %c0_5 = arith.constant 0 : index
    %3 = vector.load %arg1[%c0_3, %c0_4, %c0_5] : memref<2x8x8xf32, #tpu.memory_space<vmem>>, vector<1x8x8xf32>
    %4 = vector.shape_cast %3 : vector<1x8x8xf32> to vector<8x8xf32>
    %5 = vector.extract_strided_slice %2 {offsets = [0, 0], sizes = [8, 128], strides = [1, 1]} : vector<16x128xf32> to vector<8x128xf32>
    %cst_6 = arith.constant dense<0.000000e+00> : vector<8x128xf32>
    %6 = tpu.matmul %4, %5, %cst_6 {dimension_numbers = #tpu.dot_dimension_numbers<[1], [0], [0], [1], [0, 0, 1, 1], [], []>} : vector<8x8xf32>, vector<8x128xf32>, vector<8x128xf32> -> vector<8x128xf32>
    %c0_7 = arith.constant 0 : index
    %c0_8 = arith.constant 0 : index
    %7 = vector.load %arg9[%c0_7, %c0_8] : memref<16x128xf32, #tpu.memory_space<vmem>>, vector<8x128xf32>
    tpu.vector_store %arg9[%c0_7, %c0_8], %6 {strides = array<i32>} : memref<16x128xf32, #tpu.memory_space<vmem>>, vector<8x128xf32>,
    %c1 = arith.constant 1 : index
    %c0_9 = arith.constant 0 : index
    %c0_10 = arith.constant 0 : index
    %8 = vector.load %arg1[%c1, %c0_9, %c0_10] : memref<2x8x8xf32, #tpu.memory_space<vmem>>, vector<1x8x8xf32>
    %9 = vector.shape_cast %8 : vector<1x8x8xf32> to vector<8x8xf32>
    %10 = vector.extract_strided_slice %2 {offsets = [8, 0], sizes = [8, 128], strides = [1, 1]} : vector<16x128xf32> to vector<8x128xf32>
    %cst_11 = arith.constant dense<0.000000e+00> : vector<8x128xf32>
    %11 = tpu.matmul %9, %10, %cst_11 {dimension_numbers = #tpu.dot_dimension_numbers<[1], [0], [0], [1], [0, 0, 1, 1], [], []>} : vector<8x8xf32>, vector<8x128xf32>, vector<8x128xf32> -> vector<8x128xf32>
    %c8 = arith.constant 8 : index
    %c0_12 = arith.constant 0 : index
    %12 = vector.load %arg9[%c8, %c0_12] : memref<16x128xf32, #tpu.memory_space<vmem>>, vector<8x128xf32>
    tpu.vector_store %arg9[%c8, %c0_12], %11 {strides = array<i32>} : memref<16x128xf32, #tpu.memory_space<vmem>>, vector<8x128xf32>,
    %c0_13 = arith.constant 0 : index
    %c0_14 = arith.constant 0 : index
    %13 = vector.load %arg9[%c0_13, %c0_14] : memref<16x128xf32, #tpu.memory_space<vmem>>, vector<16x128xf32>
    %c0_15 = arith.constant 0 : index
    %c0_16 = arith.constant 0 : index
    %14 = vector.load %arg3[%c0_15, %c0_16] : memref<1x128xf32, #tpu.memory_space<vmem>>, vector<1x128xf32>
    %15 = vector.broadcast %14 : vector<1x128xf32> to vector<16x128xf32>
    %16 = arith.addf %13, %15 : vector<16x128xf32>
    %cst_17 = arith.constant 0.000000e+00 : f32
    %17 = vector.broadcast %cst_17 : f32 to vector<16x128xf32>
    %18 = arith.cmpf ogt, %16, %17 : vector<16x128xf32>
    %cst_18 = arith.constant 0.00999999977 : f32
    %19 = vector.broadcast %cst_18 : f32 to vector<16x128xf32>
    %20 = arith.mulf %19, %16 : vector<16x128xf32>
    %21 = arith.select %18, %16, %20 : vector<16x128xi1>, vector<16x128xf32>
    %22 = arith.truncf %21 : vector<16x128xf32> to vector<16x128xbf16>
    %c0_19 = arith.constant 0 : index
    %c0_20 = arith.constant 0 : index
    %23 = vector.load %arg4[%c0_19, %c0_20] : memref<128x128xbf16, #tpu.memory_space<vmem>>, vector<128x128xbf16>
    %cst_21 = arith.constant dense<0.000000e+00> : vector<16x128xf32>
    %24 = tpu.matmul %22, %23, %cst_21 {dimension_numbers = #tpu.dot_dimension_numbers<[1], [0], [0], [1], [0, 0, 1, 1], [], []>} : vector<16x128xbf16>, vector<128x128xbf16>, vector<16x128xf32> -> vector<16x128xf32>
    %c0_22 = arith.constant 0 : index
    %c0_23 = arith.constant 0 : index
    %25 = vector.load %arg5[%c0_22, %c0_23] : memref<1x128xf32, #tpu.memory_space<vmem>>, vector<1x128xf32>
    %26 = vector.broadcast %25 : vector<1x128xf32> to vector<16x128xf32>
    %27 = arith.addf %24, %26 : vector<16x128xf32>
    %cst_24 = arith.constant 0.000000e+00 : f32
    %28 = vector.broadcast %cst_24 : f32 to vector<16x128xf32>
    %29 = arith.cmpf ogt, %27, %28 : vector<16x128xf32>
    %cst_25 = arith.constant 0.00999999977 : f32
    %30 = vector.broadcast %cst_25 : f32 to vector<16x128xf32>
    %31 = arith.mulf %30, %27 : vector<16x128xf32>
    %32 = arith.select %29, %27, %31 : vector<16x128xi1>, vector<16x128xf32>
    %33 = arith.truncf %32 : vector<16x128xf32> to vector<16x128xbf16>
    %c0_26 = arith.constant 0 : index
    %c0_27 = arith.constant 0 : index
    %34 = vector.load %arg6[%c0_26, %c0_27] : memref<128x128xbf16, #tpu.memory_space<vmem>>, vector<128x128xbf16>
    %cst_28 = arith.constant dense<0.000000e+00> : vector<16x128xf32>
    %35 = tpu.matmul %33, %34, %cst_28 {dimension_numbers = #tpu.dot_dimension_numbers<[1], [0], [0], [1], [0, 0, 1, 1], [], []>} : vector<16x128xbf16>, vector<128x128xbf16>, vector<16x128xf32> -> vector<16x128xf32>
    %c0_29 = arith.constant 0 : index
    %c0_30 = arith.constant 0 : index
    %36 = vector.load %arg7[%c0_29, %c0_30] : memref<1x128xf32, #tpu.memory_space<vmem>>, vector<1x128xf32>
    %37 = vector.broadcast %36 : vector<1x128xf32> to vector<16x128xf32>
    %38 = arith.addf %35, %37 : vector<16x128xf32>
    %c0_31 = arith.constant 0 : index
    %c0_32 = arith.constant 0 : index
    %39 = vector.load %arg8[%c0_31, %c0_32] : memref<16x128xf32, #tpu.memory_space<vmem>>, vector<16x128xf32>
    tpu.vector_store %arg8[%c0_31, %c0_32], %38 {strides = array<i32>} : memref<16x128xf32, #tpu.memory_space<vmem>>, vector<16x128xf32>,
    return
  }
}

</mosaic_0001>

<bundles_post_ra>
// kernel: tpu_custom_call.1
= control target key start
LH: loop header
LB: loop body
LE: loop exit
PB: predicated region body
PF: predicated region fallthrough
CT: control target
= control target key end

     0   :  { %13 = vsyncpa [#allocation4], 0  ;;  %s1134_s0 = inlined_call_operand.hbm [shape: bf16[16,128], index: 0, kind: input, shape index: {}]   ;;  %s1135_s1 = inlined_call_operand.hbm [shape: f32[2,8,8], index: 1, kind: input, shape index: {}]   ;;  %s1136_s2 = inlined_call_operand.hbm [shape: bf16[128,128], index: 2, kind: input, shape index: {}]   ;;  %s1137_s3 = inlined_call_operand.vmem [shape: f32[1,128], index: 3, kind: input, shape index: {}]   ;;  %s1138_s4 = inlined_call_operand.hbm [shape: bf16[128,128], index: 4, kind: input, shape index: {}]   ;;  %s1139_s5 = inlined_call_operand.vmem [shape: f32[1,128], index: 5, kind: input, shape index: {}]   ;;  %s1140_s6 = inlined_call_operand.hbm [shape: bf16[128,128], index: 6, kind: input, shape index: {}]   ;;  %s1141_s7 = inlined_call_operand.vmem [shape: f32[1,128], index: 7, kind: input, shape index: {}]   ;;  %s1142_s8 = inlined_call_operand.hbm [shape: f32[16,128], index: 8, kind: output, shape index: {}]  }
   0x1   :  { %14 = vsyncpa [#allocation7], 0 }
   0x2   :  { %15 = vsyncpa [#allocation10], 0 }
   0x3   :  { %16 = vsyncpa [#allocation5], 0  ;;  %s942_s27 = smov [#allocation6]   ;;  %s802_s9 = scalar_lea.hbm %s1135_s1, 256 }
   0x4   :  { %s34_s28 = sshll.u32 %s942_s27, 4  ;;  %p803_p0 = scmp.ne.s32.totalorder %s1135_s1, %s802_s9  ;;  %s35_s28 = int_to_ptr.vmem [resolvable:$true] %s34_s28 }
   0x5   :  { %p806_p1 = scmp.lt.u32.totalorder %s802_s9, %s1135_s1 }
   0x7   :  { %p808_p2 = pnand %p806_p1, %p803_p0 }
   0x9   :  { %811 = shalt.err (!%p808_p2)
}
   0xa   :  { %s812_s14 = scalar_lea.vmem %s35_s28, 256  ;;  %p817_p4 = scmp.lt.s32.totalorder %s35_s28, %s35_s28 }
   0xb   :  { %p813_p3 = scmp.ne.s32.totalorder %s35_s28, %s812_s14  ;;  %p818_p5 = scmp.lt.s32.totalorder %s812_s14, %s812_s14 }
   0xd   :  { %p819_p6 = por %p818_p5, %p817_p4 }
   0xf   :  { %p820_p7 = pnand %p819_p6, %p813_p3 }
  0x11   :  { %823 = shalt.err (!%p820_p7)
}
  0x12   :  { %s943_s15 = smov 128   ;;  %s944_s16 = smov 8  }
  0x13   :  { %40 = dma.hbm_to_vmem [thread:$0]  %s1135_s1, 256, %s35_s28, [#allocation7], %s943_s15, %s943_s15, %s944_s16  }
  0x14   :  { %s945_s19 = smov [#allocation9]   ;;  %s946_s21 = smov [#allocation3]  }
  0x15   :  { %s60_s20 = sshll.u32 %s945_s19, 4  ;;  %s22_s22 = sshll.u32 %s946_s21, 4  ;;  %s61_s20 = int_to_ptr.vmem [resolvable:$true] %s60_s20  ;;  %s23_s22 = int_to_ptr.vmem [resolvable:$true] %s22_s22 }
  0x16   :  { %s824_s25 = scalar_lea.hbm %s1138_s4, 1024 }
  0x17   :  { %p825_p8 = scmp.ne.s32.totalorder %s1138_s4, %s824_s25  ;;  %p828_p9 = scmp.lt.u32.totalorder %s824_s25, %s1138_s4 }
  0x19   :  { %p830_p10 = pnand %p828_p9, %p825_p8 }
  0x1b   :  { %833 = shalt.err (!%p830_p10)
}
  0x1c   :  { %s834_s1 = scalar_lea.vmem %s61_s20, 1024  ;;  %p839_p12 = scmp.lt.s32.totalorder %s61_s20, %s61_s20 }
  0x1d   :  { %p835_p11 = scmp.ne.s32.totalorder %s61_s20, %s834_s1  ;;  %p840_p13 = scmp.lt.s32.totalorder %s834_s1, %s834_s1 }
  0x1f   :  { %p841_p0 = por %p840_p13, %p839_p12 }
  0x21   :  { %p842_p1 = pnand %p841_p0, %p835_p11 }
  0x23   :  { %845 = shalt.err (!%p842_p1)
}
  0x24   :  { %s947_s28 = smov 64   ;;  %s948_s9 = smov 4  }
  0x25   :  { %66 = dma.hbm_to_vmem [thread:$0]  %s1138_s4, 1024, %s61_s20, [#allocation10], %s947_s28, %s947_s28, %s948_s9  }
  0x26   :  { %s846_s14 = scalar_lea.hbm %s1134_s0, 128 }
  0x27   :  { %p847_p2 = scmp.ne.s32.totalorder %s1134_s0, %s846_s14  ;;  %p850_p3 = scmp.lt.u32.totalorder %s846_s14, %s1134_s0 }
  0x29   :  { %p852_p4 = pnand %p850_p3, %p847_p2 }
  0x2b   :  { %855 = shalt.err (!%p852_p4)
}
  0x2c   :  { %s856_s23 = scalar_lea.vmem %s23_s22, 128  ;;  %p861_p6 = scmp.lt.s32.totalorder %s23_s22, %s23_s22 }
  0x2d   :  { %p857_p5 = scmp.ne.s32.totalorder %s23_s22, %s856_s23  ;;  %p862_p7 = scmp.lt.s32.totalorder %s856_s23, %s856_s23 }
  0x2f   :  { %p863_p8 = por %p862_p7, %p861_p6 }
  0x31   :  { %p864_p9 = pnand %p863_p8, %p857_p5 }
  0x33   :  { %867 = shalt.err (!%p864_p9)
}
  0x34   :  { %28 = dma.hbm_to_vmem [thread:$0]  %s1134_s0, 128, %s23_s22, [#allocation4], %s947_s28, %s947_s28, %s948_s9  }
  0x35   :  { %s949_s24 = smov [#allocation8]   ;;  %s950_s26 = smov [#allocation11]  }
  0x36   :  { %s46_s25 = sshll.u32 %s949_s24, 4  ;;  %s74_s27 = sshll.u32 %s950_s26, 4  ;;  %s47_s25 = int_to_ptr.vmem [resolvable:$true] %s46_s25  ;;  %s75_s27 = int_to_ptr.vmem [resolvable:$true] %s74_s27 }
  0x37   :  { %s868_s1 = scalar_lea.hbm %s1136_s2, 1024 }
  0x38   :  { %p869_p10 = scmp.ne.s32.totalorder %s1136_s2, %s868_s1  ;;  %p872_p11 = scmp.lt.u32.totalorder %s868_s1, %s1136_s2 }
  0x3a   :  { %p874_p12 = pnand %p872_p11, %p869_p10 }
  0x3c   :  { %877 = shalt.err (!%p874_p12)
}
  0x3d   :  { %s878_s0 = scalar_lea.vmem %s47_s25, 1024  ;;  %p883_p0 = scmp.lt.s32.totalorder %s47_s25, %s47_s25 }
  0x3e   :  { %p879_p13 = scmp.ne.s32.totalorder %s47_s25, %s878_s0  ;;  %p884_p1 = scmp.lt.s32.totalorder %s878_s0, %s878_s0 }
  0x40   :  { %p885_p2 = por %p884_p1, %p883_p0 }
  0x42   :  { %p886_p3 = pnand %p885_p2, %p879_p13 }
  0x44   :  { %889 = shalt.err (!%p886_p3)
}
  0x45   :  { %52 = dma.hbm_to_vmem [thread:$0]  %s1136_s2, 1024, %s47_s25, [#allocation7], %s947_s28, %s947_s28, %s948_s9  }
  0x46   :  { %s890_s19 = scalar_lea.hbm %s1140_s6, 1024 }
  0x47   :  { %p891_p4 = scmp.ne.s32.totalorder %s1140_s6, %s890_s19  ;;  %p894_p5 = scmp.lt.u32.totalorder %s890_s19, %s1140_s6 }
  0x49   :  { %p896_p6 = pnand %p894_p5, %p891_p4 }
  0x4b   :  { %899 = shalt.err (!%p896_p6)
}
  0x4c   :  { %s900_s24 = scalar_lea.vmem %s75_s27, 1024  ;;  %p905_p8 = scmp.lt.s32.totalorder %s75_s27, %s75_s27 }
  0x4d   :  { %p901_p7 = scmp.ne.s32.totalorder %s75_s27, %s900_s24  ;;  %p906_p9 = scmp.lt.s32.totalorder %s900_s24, %s900_s24 }
  0x4f   :  { %p907_p10 = por %p906_p9, %p905_p8 }
  0x51   :  { %p908_p11 = pnand %p907_p10, %p901_p7 }
  0x53   :  { %911 = shalt.err (!%p908_p11)
}
  0x54   :  { %80 = dma.hbm_to_vmem [thread:$0]  %s1140_s6, 1024, %s75_s27, [#allocation10], %s947_s28, %s947_s28, %s948_s9  }
  0x55   :  { %934 = dma.done.wait [#allocation4], 128  }
  0x56   :  { %935 = vsyncadd [#allocation4], 4294967168 }
  0x57   :  { %936 = dma.done.wait [#allocation7], 1280  }
  0x58   :  { %937 = vsyncadd [#allocation7], 4294966016 }
  0x59   :  { %938 = dma.done.wait [#allocation10], 2048  }
  0x5a   :  { %939 = vsyncadd [#allocation10], 4294965248  ;;  %v951_v0 = vmov 0.0   ;;  %vm952_vm0 = vmmov 0   ;;  %v777_v1 = vld [vmem:[#allocation8] sm:$0xff]   ;;  %v778_v2 = vld [vmem:[#allocation8 + $0x8] sm:$0xff]  }
  0x5b   :  { %695 = vmatprep.subr.bf16.mxu0 %v951_v0  ;;  %711 = vmatprep.mubr.msk.bf16.mxu0 %vm952_vm0, %v951_v0  ;;  %v779_v3 = vld [vmem:[#allocation8 + $0x10] sm:$0xff]   ;;  %v780_v4 = vld [vmem:[#allocation8 + $0x18] sm:$0xff]   ;;  %v781_v5 = vld [vmem:[#allocation8 + $0x20] sm:$0xff]   ;;  %vm213_vm1 = vcmask 64512  }
  0x5c   :  { %715 = vmatprep.subr.mxu1 %v951_v0  ;;  %717 = vmatprep.mubr.msk.f32.mxu1 %vm952_vm0, %v951_v0  ;;  %v782_v6 = vld [vmem:[#allocation8 + $0x28] sm:$0xff]   ;;  %v783_v7 = vld [vmem:[#allocation8 + $0x30] sm:$0xff]   ;;  %v784_v8 = vld [vmem:[#allocation8 + $0x38] sm:$0xff]  }
  0x5d   :  { %696 = vmatpush3.bf16.msra.mxu0 %v777_v1  ;;  %v785_v9 = vld [vmem:[#allocation3] sm:$0xff]   ;;  %v212_v10 = vld [vmem:[#allocation6] sm:$0xff]  ;;  %v289_v15 = vld [vmem:[#allocation6 + $0x8] sm:$0xff] }
  0x5e   :  { %697 = vmatprep.subr.bf16.mxu0 %v951_v0  ;;  %v786_v16 = vld [vmem:[#allocation9] sm:$0xff]   ;;  %v787_v17 = vld [vmem:[#allocation9 + $0x8] sm:$0xff]   ;;  %v788_v18 = vld [vmem:[#allocation9 + $0x10] sm:$0xff]  }
  0x5f   :  { %v789_v19 = vld [vmem:[#allocation9 + $0x18] sm:$0xff]   ;;  %v790_v20 = vld [vmem:[#allocation9 + $0x20] sm:$0xff]   ;;  %v791_v21 = vld [vmem:[#allocation9 + $0x28] sm:$0xff]  }
  0x60   :  { %v792_v22 = vld [vmem:[#allocation9 + $0x30] sm:$0xff]   ;;  %v793_v23 = vld [vmem:[#allocation9 + $0x38] sm:$0xff]   ;;  %v794_v24 = vld [vmem:[#allocation11] sm:$0xff]  }
  0x61   :  { %698 = vmatpush3.bf16.msra.mxu0 %v778_v2  ;;  %v795_v25 = vld [vmem:[#allocation11 + $0x8] sm:$0xff]   ;;  %v796_v26 = vld [vmem:[#allocation11 + $0x10] sm:$0xff]   ;;  %v797_v27 = vld [vmem:[#allocation11 + $0x18] sm:$0xff]  }
  0x62   :  { %699 = vmatprep.subr.bf16.mxu0 %v951_v0  ;;  %v798_v28 = vld [vmem:[#allocation11 + $0x20] sm:$0xff]   ;;  %v799_v29 = vld [vmem:[#allocation11 + $0x28] sm:$0xff]   ;;  %v800_v42 = vld [vmem:[#allocation11 + $0x30] sm:$0xff]  }
  0x63   :  { %v645_v30 = vld [vmem:[%s1137_s3] ss:$0 sm:$0xff]  ;;  %v801_v43 = vld [vmem:[#allocation11 + $0x38] sm:$0xff]  }
  0x64   :  { %v646_v44 = vld [vmem:[%s1139_s5] ss:$0 sm:$0xff]  ;;  %s953_s5 = smov [#allocation12]  }
  0x65   :  { %700 = vmatpush3.bf16.msra.mxu0 %v779_v3  ;;  %v655_v56 = vld [vmem:[%s1141_s7] ss:$0 sm:$0xff]  ;;  %s620_s29 = sshll.u32 %s953_s5, 4  ;;  %s621_s29 = int_to_ptr.vmem [resolvable:$true] %s620_s29 }
  0x66   :  { %701 = vmatprep.subr.bf16.mxu0 %v951_v0  ;;  %s912_s30 = scalar_lea.vmem %s621_s29, 256  ;;  %p917_p13 = scmp.lt.s32.totalorder %s621_s29, %s621_s29 }
  0x67   :  { %p913_p12 = scmp.ne.s32.totalorder %s621_s29, %s912_s30  ;;  %p918_p0 = scmp.lt.s32.totalorder %s912_s30, %s912_s30 }
  0x69   :  { %702 = vmatpush3.bf16.msra.mxu0 %v780_v4  ;;  %p919_p1 = por %p918_p0, %p917_p13 }
  0x6a   :  { %703 = vmatprep.subr.bf16.mxu0 %v951_v0 }
  0x6b   :  { %p920_p2 = pnand %p919_p1, %p913_p12 }
  0x6d   :  { %704 = vmatpush3.bf16.msra.mxu0 %v781_v5 }
  0x6e   :  { %705 = vmatprep.subr.bf16.mxu0 %v951_v0 }
  0x71   :  { %706 = vmatpush3.bf16.msra.mxu0 %v782_v6 }
  0x72   :  { %707 = vmatprep.subr.bf16.mxu0 %v951_v0 }
  0x75   :  { %708 = vmatpush3.bf16.msra.mxu0 %v783_v7 }
  0x76   :  { %709 = vmatprep.subr.bf16.mxu0 %v951_v0 }
  0x79   :  { %710 = vmatpush3.bf16.msra.mxu0 %v784_v8 }
  0x7a   :  { %745 = vmatprep.subr.bf16.mxu0 %v951_v0 }
  0x7c   :  { %712 = vmatmul.mubr.bf16.vlgmr.msra.gmra.mrb[0].mxu0 %v785_v9 }
  0x7d   :  { %761 = vmatprep.mubr.msk.bf16.mxu0 %vm952_vm0, %v951_v0  ;;  %746 = vmatpush3.bf16.msra.mxu0 %v794_v24 }
  0x7e   :  { %747 = vmatprep.subr.bf16.mxu0 %v951_v0 }
  0x81   :  { %748 = vmatpush3.bf16.msra.mxu0 %v795_v25 }
  0x82   :  { %749 = vmatprep.subr.bf16.mxu0 %v951_v0 }
  0x85   :  { %750 = vmatpush3.bf16.msra.mxu0 %v796_v26 }
  0x86   :  { %751 = vmatprep.subr.bf16.mxu0 %v951_v0 }
  0x89   :  { %752 = vmatpush3.bf16.msra.mxu0 %v797_v27 }
  0x8a   :  { %753 = vmatprep.subr.bf16.mxu0 %v951_v0 }
  0x8d   :  { %754 = vmatpush3.bf16.msra.mxu0 %v798_v28 }
  0x8e   :  { %755 = vmatprep.subr.bf16.mxu0 %v951_v0 }
  0x91   :  { %756 = vmatpush3.bf16.msra.mxu0 %v799_v29 }
  0x92   :  { %757 = vmatprep.subr.bf16.mxu0 %v951_v0 }
  0x95   :  { %758 = vmatpush3.bf16.msra.mxu0 %v800_v42 }
  0x96   :  { %759 = vmatprep.subr.bf16.mxu0 %v951_v0 }
  0x99   :  { %760 = vmatpush3.bf16.msra.mxu0 %v801_v43 }
 0x14f   :  { %v205_v11 = vpop.f32.mrb[0].mxu0 }
 0x150   :  { %v713_v12 = vpop.f32.mrb[1].mxu0  ;;  %716 = vmatpush3.msra.mxu1 %v205_v11 }
 0x151   :  { %v208_v13 = vpop.f32.mrb[2].mxu0  ;;  %718 = vmatmul.mubr.msk.f32.vlgmr.msra.gmra.mrb[0].mxu1 %vm213_vm1, %v212_v10  ;;  %720 = vmatprep.subr.mxu1 %v951_v0 }
 0x152   :  { %v714_v14 = vpop.f32.mrb[3].mxu0  ;;  %721 = vmatpush3.msra.mxu1 %v208_v13  ;;  %722 = vmatprep.mubr.msk.f32.mxu1 %vm952_vm0, %v951_v0 }
 0x153   :  { %725 = vmatprep.subr.bf16.mxu1 %v951_v0 }
 0x155   :  { %723 = vmatmul.mubr.msk.f32.vlgmr.msra.gmra.mrb[2].mxu1 %vm213_vm1, %v289_v15 }
 0x156   :  { %726 = vmatpush3.bf16.msra.mxu1 %v786_v16  ;;  %741 = vmatprep.mubr.msk.bf16.mxu1 %vm952_vm0, %v951_v0 }
 0x157   :  { %727 = vmatprep.subr.bf16.mxu1 %v951_v0 }
 0x15a   :  { %728 = vmatpush3.bf16.msra.mxu1 %v787_v17 }
 0x15b   :  { %729 = vmatprep.subr.bf16.mxu1 %v951_v0 }
 0x15e   :  { %730 = vmatpush3.bf16.msra.mxu1 %v788_v18 }
 0x15f   :  { %731 = vmatprep.subr.bf16.mxu1 %v951_v0 }
 0x162   :  { %732 = vmatpush3.bf16.msra.mxu1 %v789_v19 }
 0x163   :  { %733 = vmatprep.subr.bf16.mxu1 %v951_v0 }
 0x166   :  { %734 = vmatpush3.bf16.msra.mxu1 %v790_v20 }
 0x167   :  { %735 = vmatprep.subr.bf16.mxu1 %v951_v0 }
 0x16a   :  { %736 = vmatpush3.bf16.msra.mxu1 %v791_v21 }
 0x16b   :  { %737 = vmatprep.subr.bf16.mxu1 %v951_v0 }
 0x16e   :  { %738 = vmatpush3.bf16.msra.mxu1 %v792_v22 }
 0x16f   :  { %739 = vmatprep.subr.bf16.mxu1 %v951_v0 }
 0x172   :  { %740 = vmatpush3.bf16.msra.mxu1 %v793_v23 }
 0x224   :  { %v283_v31 = vpop.f32.mrb[0].mxu1 }
 0x225   :  { %v373_v32 = vadd.f32 %v645_v30, %v283_v31  ;;  %v719_v33 = vpop.f32.mrb[1].mxu1 }
 0x227   :  { %v377_v35 = vmul.f32 0.01, %v373_v32  ;;  %vm375_vm2 = vcmp.gt.f32.partialorder %v373_v32, 0.0 }
 0x228   :  { %v359_v34 = vpop.f32.mrb[2].mxu1 }
 0x229   :  { %v374_v36 = vadd.f32 %v645_v30, %v359_v34  ;;  %v724_v37 = vpop.f32.mrb[3].mxu1  ;;  %v379_v39 = vsel %vm375_vm2, %v373_v32, %v377_v35 }
 0x22b   :  { %vm376_vm3 = vcmp.gt.f32.partialorder %v374_v36, 0.0  ;;  %v378_v38 = vmul.f32 0.01, %v374_v36 }
 0x22d   :  { %v380_v40 = vsel %vm376_vm3, %v374_v36, %v378_v38 }
 0x22e   :  { %v381_v41 = vpack.c.bf16 %v380_v40, %v379_v39 }
 0x230   :  { %742 = vmatmul.mubr.bf16.vlgmr.msra.gmra.mrb[4].mxu1 %v381_v41 }
 0x303   :  { %v487_v45 = vpop.f32.mrb[4].mxu1 }
 0x304   :  { %v488_v46 = vadd.f32 %v646_v44, %v487_v45  ;;  %v743_v47 = vpop.f32.mrb[5].mxu1 }
 0x305   :  { %v490_v48 = vpop.f32.mrb[6].mxu1 }
 0x306   :  { %v496_v49 = vmul.f32 0.01, %v488_v46  ;;  %v491_v50 = vadd.f32 %v646_v44, %v490_v48  ;;  %v744_v51 = vpop.f32.mrb[7].mxu1  ;;  %vm494_vm4 = vcmp.gt.f32.partialorder %v488_v46, 0.0 }
 0x308   :  { %vm495_vm5 = vcmp.gt.f32.partialorder %v491_v50, 0.0  ;;  %v497_v52 = vmul.f32 0.01, %v491_v50  ;;  %v498_v53 = vsel %vm494_vm4, %v488_v46, %v496_v49 }
 0x30a   :  { %v499_v54 = vsel %vm495_vm5, %v491_v50, %v497_v52 }
 0x30b   :  { %v500_v55 = vpack.c.bf16 %v499_v54, %v498_v53 }
 0x30d   :  { %762 = vmatmul.mubr.bf16.vlgmr.msra.gmra.mrb[4].mxu0 %v500_v55 }
 0x3e0   :  { %v606_v57 = vpop.f32.mrb[4].mxu0 }
 0x3e1   :  { %v607_v58 = vadd.f32 %v655_v56, %v606_v57  ;;  %v763_v59 = vpop.f32.mrb[5].mxu0 }
 0x3e2   :  { %v609_v60 = vpop.f32.mrb[6].mxu0 }
 0x3e3   :  { %613 = vst [vmem:[#allocation12] sm:$0xff] %v607_v58  ;;  %v610_v61 = vadd.f32 %v655_v56, %v609_v60  ;;  %v764_v62 = vpop.f32.mrb[7].mxu0 }
 0x3e5   :  { %614 = vst [vmem:[#allocation12 + $0x8] sm:$0xff] %v610_v61 }
 0x3e6   :  { %923 = shalt.err (!%p920_p2)
}
 0x3e7   :  { %s924_s10 = scalar_lea.hbm %s1142_s8, 256 }
 0x3e8   :  { %p925_p3 = scmp.ne.s32.totalorder %s1142_s8, %s924_s10  ;;  %p928_p4 = scmp.lt.u32.totalorder %s924_s10, %s1142_s8 }
 0x3ea   :  { %p930_p5 = pnand %p928_p4, %p925_p3 }
 0x3ec   :  { %933 = shalt.err (!%p930_p5)
}
 0x3ed   :  { %626 = dma.vmem_to_hbm [thread:$0]  %s621_s29, 256, %s1142_s8, [#allocation5], %s943_s15, %s943_s15, %s944_s16  }
 0x3ee   :  { %940 = dma.done.wait [#allocation5], 256  }
 0x3ef   :  { %941 = vsyncadd [#allocation5], 4294967040 }
 0x3f0   :  { %630 = vsyncpa [#allocation4], 1 }
 0x3f1   :  { %631 = vsyncpa [#allocation7], 1 }
 0x3f2   :  { %632 = vsyncpa [#allocation10], 1 }
 0x3f3   :  { %633 = vsyncpa [#allocation5], 1 }

</bundles_post_ra>
